<compile_context>
chip_gen: v7x
topology: tpu7x:2x2x1
jax: 0.10.0
libtpu: 0.0.40
codegen_flags: <defaults>
</compile_context>

<pallas_src>
import functools

import jax
import jax.numpy as jnp
from jax.experimental import pallas as pl
from jax.experimental.pallas import tpu as pltpu


def _rmsnorm_kernel(x_ref, scale_ref, o_ref, *, eps):
    # x_ref:     (TM, D) tile of rows. The grid may end with a partial block:
    #            tail rows read undefined data, but the per-row reduction never
    #            mixes rows and tail writes are masked, so valid rows are exact.
    # scale_ref: (1, D) learned per-feature scale (constant index_map).
    # eps is a compile-time Python float (no SMEM input needed).
    scale = scale_ref[...].astype(jnp.float32)          # hoisted once per block
    x = x_ref[...].astype(jnp.float32)
    ms = jnp.mean(x * x, axis=-1, keepdims=True)
    rms = jnp.sqrt(ms)
    # Module semantics: x / (rms + eps). Exact per-row reciprocal (EUP); the
    # kernel is HBM-bound so exactness is free vs. the approx form.
    inv = pl.reciprocal(rms + eps, approx=False)
    o_ref[...] = (x * inv * scale).astype(o_ref.dtype)


def _round_up(x, m):
    return (x + m - 1) // m * m


def _row_granularity(dtype):
    """Sublane packing granularity for the row (second-to-last) axis."""
    itemsize = jnp.dtype(dtype).itemsize
    if itemsize >= 4:
        return 8
    if itemsize == 2:
        return 16
    return 32


def _vmem_plan():
    """Returns (tile_budget_bytes, vmem_limit_cap_bytes, two_tensorcores)."""
    try:
        info = pltpu.get_tpu_info()
        cap = int(getattr(info, "vmem_capacity_bytes", 64 << 20))
    except Exception:
        cap = 64 << 20  # conservative (v7x-sized)
    if cap >= (128 << 20):
        # v5e / v6e: 128 MiB VMEM, 1 TensorCore -> use most of it for big blocks.
        return 80 << 20, 100 << 20, False
    # v7x: 64 MiB per TC, 2 TCs -> leave headroom for compiler scratch / f32 temps.
    return 36 << 20, 46 << 20, True


def _pick_row_tile(rows, dim, itemsize, gran, tile_budget, two_cores):
    """Largest row tile (multiple of `gran`) whose pipelined footprint fits the budget."""
    # Per-row VMEM bytes: double-buffered input + output tiles (input dtype)
    # plus ~3 f32 temporaries (x upcast, x*x, y) live during compute.
    per_row = 4 * dim * itemsize + 12 * dim
    tile = max(gran, tile_budget // per_row)
    # Never larger than the (granularity-rounded) row count.
    tile = min(tile, _round_up(rows, gran))
    # v7x only: keep >= 4 grid steps (2 pipelined steps per TensorCore) when
    # there is enough work; single-TC generations just take the largest tile.
    if two_cores and rows > 4 * gran:
        tile = min(tile, _round_up(pl.cdiv(rows, 4), gran))
    return max(gran, (tile // gran) * gran)


def rmsnorm(x, scale, eps=1e-5, row_tile=None):
    """x: (..., dim); scale: (dim,). Returns same shape/dtype as x."""
    orig_shape = x.shape
    dim = orig_shape[-1]
    x2d = x.reshape(-1, dim)
    rows = x2d.shape[0]
    itemsize = jnp.dtype(x2d.dtype).itemsize
    gran = _row_granularity(x2d.dtype)

    tile_budget, limit_cap, two_cores = _vmem_plan()
    if row_tile is None:
        row_tile = _pick_row_tile(rows, dim, itemsize, gran, tile_budget, two_cores)

    # Non-divisible grid: Pallas masks out-of-bounds stores on the last block,
    # so no host-side pad / slice (each of which would cost an extra HBM pass).
    grid = pl.cdiv(rows, row_tile)

    scale2d = scale.reshape(1, dim)

    # Scoped VMEM: double-buffered (input + output) tiles + f32 temps + headroom.
    io_bytes = 2 * 2 * row_tile * dim * itemsize
    tmp_bytes = 3 * row_tile * dim * 4
    vmem_limit = int(min(max(io_bytes + tmp_bytes + (2 << 20), 16 << 20), limit_cap))

    kernel = functools.partial(_rmsnorm_kernel, eps=float(eps))

    out = pl.pallas_call(
        kernel,
        out_shape=jax.ShapeDtypeStruct((rows, dim), x.dtype),
        grid_spec=pltpu.PrefetchScalarGridSpec(
            num_scalar_prefetch=0,
            grid=(grid,),
            in_specs=[
                pl.BlockSpec((row_tile, dim), lambda i: (i, 0)),
                pl.BlockSpec((1, dim), lambda i: (0, 0)),
            ],
            out_specs=pl.BlockSpec((row_tile, dim), lambda i: (i, 0)),
        ),
        compiler_params=pltpu.CompilerParams(
            dimension_semantics=("parallel",),
            vmem_limit_bytes=vmem_limit,
        ),
    )(x2d, scale2d)

    return out.reshape(orig_shape)


def _reference(x, scale, eps):
    xf = x.astype(jnp.float32)
    rms = jnp.sqrt(jnp.mean(xf * xf, axis=-1, keepdims=True))
    return (scale.astype(jnp.float32) * (xf / (rms + eps))).astype(x.dtype)


if __name__ == "__main__":
    key = jax.random.PRNGKey(0)

    # Small shapes consistent with the module: (batch, seq, hidden)
    batch, seq, hidden = 2, 8, 32
    x = jax.random.normal(key, (batch, seq, hidden), dtype=jnp.float32)
    # Deterministic parameter init matching nn.Parameter(torch.ones(dim))
    scale = jnp.ones((hidden,), dtype=jnp.float32)
    eps = 1e-5

    y = jax.block_until_ready(rmsnorm(x, scale, eps))
    ref = _reference(x, scale, eps)
    assert y.shape == x.shape and y.dtype == x.dtype
    assert jnp.allclose(y, ref, atol=1e-5, rtol=1e-5)

    # Second case: rows (3*5=15) not a multiple of the tile (exercises the
    # masked partial last block) and a lane-dense dim (multiple of 128).
    key2 = jax.random.PRNGKey(1)
    x2 = jax.random.normal(key2, (3, 5, 256), dtype=jnp.float32)
    scale2 = jnp.ones((256,), dtype=jnp.float32)
    y2 = jax.block_until_ready(rmsnorm(x2, scale2, eps))
    ref2 = _reference(x2, scale2, eps)
    assert y2.shape == x2.shape and y2.dtype == x2.dtype
    assert jnp.allclose(y2, ref2, atol=1e-5, rtol=1e-5)

    # Third case: bf16 activations (16-row packing granularity path).
    x3 = jax.random.normal(jax.random.PRNGKey(2), (4, 7, 128), dtype=jnp.bfloat16)
    scale3 = jnp.ones((128,), dtype=jnp.float32)
    y3 = jax.block_until_ready(rmsnorm(x3, scale3, eps))
    ref3 = _reference(x3, scale3, eps)
    assert y3.shape == x3.shape and y3.dtype == x3.dtype
    assert jnp.allclose(y3.astype(jnp.float32), ref3.astype(jnp.float32),
                        atol=2e-2, rtol=2e-2)

    print("KERNEL_OK")
</pallas_src>

<mosaic_0001>
module attributes {stable_mosaic.version = 11 : i64} {
  func.func @_rmsnorm_kernel(%arg0: i32, %arg1: memref<16x32xf32, #tpu.memory_space<vmem>>, %arg2: memref<1x32xf32, #tpu.memory_space<vmem>>, %arg3: memref<16x32xf32, #tpu.memory_space<vmem>>) attributes {dimension_semantics = [#tpu.dimension_semantics<parallel>], iteration_bounds = array<i64: 1>, scalar_prefetch = 0 : i64, scratch_operands = 0 : i64, tpu.core_type = #tpu.core_type<tc>, window_params = [{transform_indices = @transform_0, window_bounds = array<i64: 16, 32>}, {pipeline_mode = #tpu.pipeline_mode<synchronous>, transform_indices = @transform_1, window_bounds = array<i64: 1, 32>}, {transform_indices = @transform_2, window_bounds = array<i64: 16, 32>}]} {
    %c0 = arith.constant 0 : index
    %c0_0 = arith.constant 0 : index
    %0 = vector.load %arg2[%c0, %c0_0] : memref<1x32xf32, #tpu.memory_space<vmem>>, vector<1x32xf32>
    %c0_1 = arith.constant 0 : index
    %c0_2 = arith.constant 0 : index
    %1 = vector.load %arg1[%c0_1, %c0_2] : memref<16x32xf32, #tpu.memory_space<vmem>>, vector<16x32xf32>
    %2 = arith.mulf %1, %1 : vector<16x32xf32>
    %cst = arith.constant dense<0.000000e+00> : vector<16xf32>
    %3 = vector.multi_reduction <add>, %2, %cst [1] : vector<16x32xf32> to vector<16xf32>
    %4 = vector.shape_cast %3 : vector<16xf32> to vector<16x1xf32>
    %cst_3 = arith.constant 3.200000e+01 : f32
    %5 = vector.broadcast %cst_3 : f32 to vector<16x1xf32>
    %6 = arith.divf %4, %5 : vector<16x1xf32>
    %7 = math.sqrt %6 : vector<16x1xf32>
    %cst_4 = arith.constant 9.99999974E-6 : f32
    %8 = vector.broadcast %cst_4 : f32 to vector<16x1xf32>
    %9 = arith.addf %7, %8 : vector<16x1xf32>
    %10 = tpu.reciprocal %9 : vector<16x1xf32> -> vector<16x1xf32>
    %11 = vector.broadcast %10 : vector<16x1xf32> to vector<16x32xf32>
    %12 = arith.mulf %1, %11 : vector<16x32xf32>
    %13 = vector.broadcast %0 : vector<1x32xf32> to vector<16x32xf32>
    %14 = arith.mulf %12, %13 : vector<16x32xf32>
    %c0_5 = arith.constant 0 : index
    %c0_6 = arith.constant 0 : index
    %15 = vector.load %arg3[%c0_5, %c0_6] : memref<16x32xf32, #tpu.memory_space<vmem>>, vector<16x32xf32>
    tpu.vector_store %arg3[%c0_5, %c0_6], %14 {strides = array<i32>} : memref<16x32xf32, #tpu.memory_space<vmem>>, vector<16x32xf32>,
    return
  }
  func.func @transform_0(%arg0: i32) -> (i32, i32) {
    %c0_i32 = arith.constant 0 : i32
    %c0_i32_0 = arith.constant 0 : i32
    return %arg0, %c0_i32 : i32, i32
  }
  func.func @transform_1(%arg0: i32) -> (i32, i32) {
    %c0_i32 = arith.constant 0 : i32
    %c0_i32_0 = arith.constant 0 : i32
    %c0_i32_1 = arith.constant 0 : i32
    return %c0_i32, %c0_i32_0 : i32, i32
  }
  func.func @transform_2(%arg0: i32) -> (i32, i32) {
    %c0_i32 = arith.constant 0 : i32
    %c0_i32_0 = arith.constant 0 : i32
    return %arg0, %c0_i32 : i32, i32
  }
}

</mosaic_0001>

<bundles_post_ra>
// kernel: tpu_custom_call.1
= control target key start
LH: loop header
LB: loop body
LE: loop exit
PB: predicated region body
PF: predicated region fallthrough
CT: control target
= control target key end

     0   :  { %7 = vsyncpa [#allocation3], 0  ;;  %s205_s0 = inlined_call_operand.hbm [shape: f32[16,32], index: 0, kind: input, shape index: {}]   ;;  %s206_s1 = inlined_call_operand.vmem [shape: f32[1,32], index: 1, kind: input, shape index: {}]   ;;  %s207_s2 = inlined_call_operand.hbm [shape: f32[16,32], index: 2, kind: output, shape index: {}]  }
   0x1   :  { %8 = vsyncpa [#allocation4], 0  ;;  %s149_s9 = smov [#allocation2]   ;;  %s101_s13 = scalar_lea.hbm %s205_s0, 256 }
   0x2   :  { %s14_s10 = sshll.u32 %s149_s9, 4  ;;  %p102_p0 = scmp.ne.s32.totalorder %s205_s0, %s101_s13  ;;  %s15_s10 = int_to_ptr.vmem [resolvable:$true] %s14_s10 }
   0x3   :  { %p105_p1 = scmp.lt.u32.totalorder %s101_s13, %s205_s0 }
   0x5   :  { %p107_p2 = pnand %p105_p1, %p102_p0 }
   0x7   :  { %110 = shalt.err (!%p107_p2)
}
   0x8   :  { %s111_s18 = scalar_lea.vmem %s15_s10, 256  ;;  %p116_p4 = scmp.lt.s32.totalorder %s15_s10, %s15_s10 }
   0x9   :  { %p112_p3 = scmp.ne.s32.totalorder %s15_s10, %s111_s18  ;;  %p117_p5 = scmp.lt.s32.totalorder %s111_s18, %s111_s18 }
   0xb   :  { %p118_p6 = por %p117_p5, %p116_p4 }
   0xd   :  { %p119_p7 = pnand %p118_p6, %p112_p3 }
   0xf   :  { %122 = shalt.err (!%p119_p7)
}
  0x10   :  { %s150_s19 = smov 128   ;;  %s151_s20 = smov 8  }
  0x11   :  { %20 = dma.hbm_to_vmem [thread:$0]  %s205_s0, 256, %s15_s10, [#allocation3], %s150_s19, %s150_s19, %s151_s20  }
  0x12   :  { %145 = dma.done.wait [#allocation3], 256  }
  0x13   :  { %146 = vsyncadd [#allocation3], 4294967040  ;;  %v27_v0 = vld [vmem:[#allocation2] sm:$0xff]  ;;  %vm31_vm0 = vcmask 261120   ;;  %v28_v1 = vld [vmem:[#allocation2 + $0x8] sm:$0xff]  ;;  %s152_s24 = smov [#allocation5]  }
  0x14   :  { %v29_v2 = vmul.f32 %v27_v0, %v27_v0  ;;  %v30_v3 = vmul.f32 %v28_v1, %v28_v1  ;;  %v88_v23 = vld [vmem:[%s206_s1] ss:$0 sm:$0xff]  ;;  %s76_s25 = sshll.u32 %s152_s24, 4  ;;  %s77_s25 = int_to_ptr.vmem [resolvable:$true] %s76_s25 }
  0x15   :  { %s123_s26 = scalar_lea.vmem %s77_s25, 256  ;;  %p128_p9 = scmp.lt.s32.totalorder %s77_s25, %s77_s25 }
  0x16   :  { %v32_v4 = vsel %vm31_vm0, %v29_v2, 0.0  ;;  %v35_v5 = vsel %vm31_vm0, %v30_v3, 0.0  ;;  %p124_p8 = scmp.ne.s32.totalorder %s77_s25, %s123_s26  ;;  %p129_p10 = scmp.lt.s32.totalorder %s123_s26, %s123_s26 }
  0x17   :  { %33 = vadd.xlane.f32.xlu0 %v32_v4 }
  0x18   :  { %p130_p11 = por %p129_p10, %p128_p9 }
  0x1a   :  { %p131_p12 = pnand %p130_p11, %p124_p8 }
  0x1b   :  { %36 = vadd.xlane.f32.xlu0 %v35_v5 }
  0xa4   :  { %v34_v6 = vpop.xlane.xlu0 %33 }
  0xa5   :  { %v39_v7 = vmul.f32 0.03125, %v34_v6 }
  0xa7   :  { %93 = vrsqrt.f32 %v39_v7  ;;  %vm43_vm1 = vcmp.eq.f32.partialorder %v39_v7, inf  ;;  %v46_v12 = vand.u32 2147483648, %v39_v7  ;;  %vm45_vm2 = vcmp.eq.f32.partialorder %v39_v7, 0.0 }
  0xa8   :  { %v37_v8 = vpop.xlane.xlu0 %36 }
  0xa9   :  { %v40_v9 = vmul.f32 0.03125, %v37_v8 }
  0xab   :  { %95 = vrsqrt.f32 %v40_v9  ;;  %vm50_vm3 = vcmp.eq.f32.partialorder %v40_v9, inf  ;;  %v53_v18 = vand.u32 2147483648, %v40_v9  ;;  %vm52_vm4 = vcmp.eq.f32.partialorder %v40_v9, 0.0 }
  0xb1   :  { %v94_v10 = vpop.eup %93 }
  0xb2   :  { %v42_v11 = vmul.f32 %v94_v10, %v39_v7 }
  0xb4   :  { %v44_v13 = vsel %vm43_vm1, %v39_v7, %v42_v11 }
  0xb5   :  { %v96_v14 = vpop.eup %95  ;;  %v47_v15 = vsel %vm45_vm2, %v46_v12, %v44_v13 }
  0xb6   :  { %v55_v16 = vadd.f32 1e-05, %v47_v15  ;;  %v49_v17 = vmul.f32 %v96_v14, %v40_v9 }
  0xb8   :  { %v51_v19 = vsel %vm50_vm3, %v40_v9, %v49_v17  ;;  %97 = vrcp.f32 %v55_v16 }
  0xb9   :  { %v54_v20 = vsel %vm52_vm4, %v53_v18, %v51_v19 }
  0xba   :  { %v56_v21 = vadd.f32 1e-05, %v54_v20 }
  0xbc   :  { %99 = vrcp.f32 %v56_v21 }
  0xc2   :  { %v98_v22 = vpop.eup %97 }
  0xc3   :  { %v59_v24 = vmul.f32 %v98_v22, %v27_v0 }
  0xc5   :  { %v67_v25 = vmul.f32 %v88_v23, %v59_v24 }
  0xc6   :  { %v100_v26 = vpop.eup %99 }
  0xc7   :  { %v60_v27 = vmul.f32 %v100_v26, %v28_v1  ;;  %69 = vst.msk [vmem:[#allocation5] sm:$0xff] %vm31_vm0, %v67_v25 }
  0xc9   :  { %v68_v28 = vmul.f32 %v88_v23, %v60_v27 }
  0xcb   :  { %70 = vst.msk [vmem:[#allocation5 + $0x8] sm:$0xff] %vm31_vm0, %v68_v28 }
  0xcc   :  { %134 = shalt.err (!%p131_p12)
}
  0xcd   :  { %s135_s28 = scalar_lea.hbm %s207_s2, 256 }
  0xce   :  { %p136_p13 = scmp.ne.s32.totalorder %s207_s2, %s135_s28  ;;  %p139_p0 = scmp.lt.u32.totalorder %s135_s28, %s207_s2 }
  0xd0   :  { %p141_p1 = pnand %p139_p0, %p136_p13 }
  0xd2   :  { %144 = shalt.err (!%p141_p1)
}
  0xd3   :  { %82 = dma.vmem_to_hbm [thread:$0]  %s77_s25, 256, %s207_s2, [#allocation4], %s150_s19, %s150_s19, %s151_s20  }
  0xd4   :  { %147 = dma.done.wait [#allocation4], 256  }
  0xd5   :  { %148 = vsyncadd [#allocation4], 4294967040 }
  0xd6   :  { %86 = vsyncpa [#allocation3], 1 }
  0xd7   :  { %87 = vsyncpa [#allocation4], 1 }

</bundles_post_ra>
